<compile_context>
chip_gen: v7x
topology: tpu7x:2x2x1
jax: 0.10.0
libtpu: 0.0.40
codegen_flags: <defaults>
</compile_context>

<pallas_src>
import math

import jax
import jax.numpy as jnp
from jax.experimental import pallas as pl
from jax.experimental.pallas import tpu as pltpu


_LANE = 128
_SUBLANE = 8
# Below this many total elements the fixed pallas_call launch / pipeline-prime
# cost exceeds the HBM cost of the whole reduction; let XLA handle it.
_PALLAS_MIN_ELEMENTS = 1 << 20


def _vdn_sum_kernel(q_ref, o_ref):
    # q_ref: (A, tb, W) input tile; o_ref: (tb, W) output tile.
    # Single-pass reduction over the in-block agent axis, f32 accumulation,
    # cast only on the final store (kernel is HBM-bound, upcast is free).
    o_ref[...] = jnp.sum(q_ref[...].astype(jnp.float32), axis=0).astype(o_ref.dtype)


def vdn_mixer(q_values, *, force_pallas: bool = False) -> jax.Array:
    """VDNMixer.forward: sum(q_values).

    q_values: list/tuple of per-agent arrays with identical shape, or an
              already-stacked array of shape (A, *rest).
    returns:  array of shape `rest` == elementwise sum over the agent axis.
    """
    if isinstance(q_values, (list, tuple)):
        if len(q_values) == 0:
            raise ValueError("vdn_mixer: empty q_values list")
        q = jnp.stack(list(q_values), axis=0)
    else:
        q = q_values

    A = q.shape[0]
    rest = q.shape[1:]
    out_dtype = q.dtype
    if A == 0:
        return jnp.zeros(rest, dtype=out_dtype)

    n = int(math.prod(rest)) if rest else 1
    if not force_pallas and A * n < _PALLAS_MIN_ELEMENTS:
        # Tiny VDN shapes: plain fused reduce beats any kernel launch.
        return jnp.sum(q.astype(jnp.float32), axis=0).astype(out_dtype)

    # ---- layout plumbing: flatten trailing dims into lane-dense rows -------
    q2 = q.reshape(A, n)
    W = min(512, pl.cdiv(n, _LANE) * _LANE)     # lane-dense row width (x128)
    r0 = pl.cdiv(n, W)                          # rows needed before padding

    # Row-tile size from a VMEM budget: 2x double-buffered (A, tb, W) input
    # + 2x (tb, W) output, conservative across v5e (16 MiB scoped default)
    # and v7x (64 MiB physical VMEM).
    isz = q.dtype.itemsize
    budget = 8 * 1024 * 1024
    tb_cap = (budget // (2 * W * isz * (A + 1))) // _SUBLANE * _SUBLANE
    tb_cap = max(_SUBLANE, min(512, tb_cap))
    if r0 <= tb_cap:
        tb, rows = r0, r0                       # block spans full row dim
    else:
        tb = tb_cap
        rows = pl.cdiv(r0, tb) * tb             # pad rows to multiple of tb

    n_pad = rows * W
    if n_pad != n:
        q2 = jnp.pad(q2, ((0, 0), (0, n_pad - n)))
    q3 = q2.reshape(A, rows, W)

    est_vmem = 2 * (A * tb * W + tb * W) * isz + (1 << 20)
    vmem_limit = int(min(96 * 1024 * 1024, max(est_vmem, 16 * 1024 * 1024)))

    out = pl.pallas_call(
        _vdn_sum_kernel,
        out_shape=jax.ShapeDtypeStruct((rows, W), out_dtype),
        grid_spec=pl.GridSpec(
            grid=(rows // tb,),
            in_specs=[pl.BlockSpec((A, tb, W), lambda i: (0, i, 0))],
            out_specs=pl.BlockSpec((tb, W), lambda i: (i, 0)),
        ),
        compiler_params=pltpu.CompilerParams(
            dimension_semantics=("parallel",),   # independent batch tiles
            vmem_limit_bytes=vmem_limit,
        ),
    )(q3)

    return out.reshape(-1)[:n].reshape(rest)


if __name__ == "__main__":
    key = jax.random.PRNGKey(0)

    # --- small test (shapes implied by the module): 4 agents, batch 8, q_dim 128
    n_agents, batch, q_dim = 4, 8, 128
    keys = jax.random.split(key, n_agents)
    q_values = [jax.random.normal(k, (batch, q_dim), dtype=jnp.float32) for k in keys]
    ref_small = sum(q_values)  # identical to the PyTorch forward

    out_fallback = jax.block_until_ready(vdn_mixer(q_values))               # XLA fallback path
    out_pallas = jax.block_until_ready(vdn_mixer(q_values, force_pallas=True))  # Pallas path
    assert out_pallas.shape == ref_small.shape and out_pallas.dtype == ref_small.dtype
    assert jnp.allclose(out_fallback, ref_small, atol=1e-5, rtol=1e-5)
    assert jnp.allclose(out_pallas, ref_small, atol=1e-5, rtol=1e-5)

    # --- larger test exercising multi-tile grid, flattening (D not x128), padding
    n_agents2, batch2, q_dim2 = 4, 4096, 96
    q_big = jax.random.normal(jax.random.PRNGKey(1),
                              (n_agents2, batch2, q_dim2), dtype=jnp.float32)
    out_big = jax.block_until_ready(vdn_mixer(q_big))       # auto-selects Pallas path
    ref_big = jnp.sum(q_big, axis=0)
    assert out_big.shape == ref_big.shape and out_big.dtype == ref_big.dtype
    assert jnp.allclose(out_big, ref_big, atol=1e-5, rtol=1e-5)

    print("KERNEL_OK")
</pallas_src>

<mosaic_0001>
module attributes {stable_mosaic.version = 11 : i64} {
  func.func @_vdn_sum_kernel(%arg0: i32, %arg1: memref<4x2x512xf32, #tpu.memory_space<vmem>>, %arg2: memref<2x512xf32, #tpu.memory_space<vmem>>) attributes {dimension_semantics = [#tpu.dimension_semantics<parallel>], iteration_bounds = array<i64: 1>, scalar_prefetch = 0 : i64, scratch_operands = 0 : i64, tpu.core_type = #tpu.core_type<tc>, window_params = [{transform_indices = @transform_0, window_bounds = array<i64: 4, 2, 512>}, {transform_indices = @transform_1, window_bounds = array<i64: 2, 512>}]} {
    %c0 = arith.constant 0 : index
    %c0_0 = arith.constant 0 : index
    %c0_1 = arith.constant 0 : index
    %0 = vector.load %arg1[%c0, %c0_0, %c0_1] : memref<4x2x512xf32, #tpu.memory_space<vmem>>, vector<4x2x512xf32>
    %cst = arith.constant dense<0.000000e+00> : vector<2x512xf32>
    %1 = vector.multi_reduction <add>, %0, %cst [0] : vector<4x2x512xf32> to vector<2x512xf32>
    %c0_2 = arith.constant 0 : index
    %c0_3 = arith.constant 0 : index
    %2 = vector.load %arg2[%c0_2, %c0_3] : memref<2x512xf32, #tpu.memory_space<vmem>>, vector<2x512xf32>
    tpu.vector_store %arg2[%c0_2, %c0_3], %1 {strides = array<i32>} : memref<2x512xf32, #tpu.memory_space<vmem>>, vector<2x512xf32>,
    return
  }
  func.func @transform_0(%arg0: i32) -> (i32, i32, i32) {
    %c0_i32 = arith.constant 0 : i32
    %c0_i32_0 = arith.constant 0 : i32
    %c0_i32_1 = arith.constant 0 : i32
    return %c0_i32, %arg0, %c0_i32_0 : i32, i32, i32
  }
  func.func @transform_1(%arg0: i32) -> (i32, i32) {
    %c0_i32 = arith.constant 0 : i32
    %c0_i32_0 = arith.constant 0 : i32
    return %arg0, %c0_i32 : i32, i32
  }
}

</mosaic_0001>

<bundles_post_ra>
// kernel: tpu_custom_call.1
= control target key start
LH: loop header
LB: loop body
LE: loop exit
PB: predicated region body
PF: predicated region fallthrough
CT: control target
= control target key end

     0   :  { %6 = vsyncpa [#allocation3], 0  ;;  %s294_s0 = inlined_call_operand.hbm [shape: f32[4,2,512], index: 0, kind: input, shape index: {}]   ;;  %s295_s1 = inlined_call_operand.hbm [shape: f32[2,512], index: 1, kind: output, shape index: {}]  }
   0x1   :  { %7 = vsyncpa [#allocation4], 0  ;;  %s239_s6 = smov [#allocation2]   ;;  %s191_s10 = scalar_lea.hbm %s294_s0, 512 }
   0x2   :  { %s13_s7 = sshll.u32 %s239_s6, 4  ;;  %p192_p0 = scmp.ne.s32.totalorder %s294_s0, %s191_s10  ;;  %s14_s7 = int_to_ptr.vmem [resolvable:$true] %s13_s7 }
   0x3   :  { %p195_p1 = scmp.lt.u32.totalorder %s191_s10, %s294_s0 }
   0x5   :  { %p197_p2 = pnand %p195_p1, %p192_p0 }
   0x7   :  { %200 = shalt.err (!%p197_p2)
}
   0x8   :  { %s201_s15 = scalar_lea.vmem %s14_s7, 512  ;;  %p206_p4 = scmp.lt.s32.totalorder %s14_s7, %s14_s7 }
   0x9   :  { %p202_p3 = scmp.ne.s32.totalorder %s14_s7, %s201_s15  ;;  %p207_p5 = scmp.lt.s32.totalorder %s201_s15, %s201_s15 }
   0xb   :  { %p208_p6 = por %p207_p5, %p206_p4 }
   0xd   :  { %p209_p7 = pnand %p208_p6, %p202_p3 }
   0xf   :  { %212 = shalt.err (!%p209_p7)
}
  0x10   :  { %s240_s16 = smov 128   ;;  %s241_s17 = smov 8  }
  0x11   :  { %19 = dma.hbm_to_vmem [thread:$0]  %s294_s0, 512, %s14_s7, [#allocation3], %s240_s16, %s240_s16, %s241_s17  }
  0x12   :  { %235 = dma.done.wait [#allocation3], 512  }
  0x13   :  { %236 = vsyncadd [#allocation3], 4294966784  ;;  %v35_v0 = vlaneseq  ;;  %v242_v1 = vmov 1983009808   ;;  %v23_v6 = vld [vmem:[#allocation2] sm:$0xff]  ;;  %v24_v7 = vld [vmem:[#allocation2 + $0x8] sm:$0xff] }
  0x14   :  { %v33_v2 = vunpack.c.l.s4 %v242_v1  ;;  %v25_v8 = vld [vmem:[#allocation2 + $0x10] sm:$0xff]  ;;  %vm115_vm0 = vcmask 1041408   ;;  %v26_v9 = vld [vmem:[#allocation2 + $0x18] sm:$0xff]  ;;  %v31_v10 = vcombine.high %v23_v6, %v23_v6  ;;  %v48_v12 = vcombine.high %v24_v7, %v24_v7  ;;  %s243_s0 = smov [#allocation5]  }
  0x15   :  { %v36_v3 = vshrl.u32 %v35_v0, 7  ;;  %v65_v14 = vcombine.high %v25_v8, %v25_v8  ;;  %v82_v16 = vcombine.high %v26_v9, %v26_v9  ;;  %s173_s20 = sshll.u32 %s243_s0, 4  ;;  %s174_s20 = int_to_ptr.vmem [resolvable:$true] %s173_s20 }
  0x16   :  { %v34_v4 = vunpack.c.0.s8 %v33_v2  ;;  %s213_s21 = scalar_lea.vmem %s174_s20, 128  ;;  %p218_p9 = scmp.lt.s32.totalorder %s174_s20, %s174_s20 }
  0x17   :  { %p214_p8 = scmp.ne.s32.totalorder %s174_s20, %s213_s21  ;;  %p219_p10 = scmp.lt.s32.totalorder %s213_s21, %s213_s21 }
  0x18   :  { %v37_v5 = vsub.s32 %v34_v4, %v36_v3 }
  0x19   :  { %p220_p11 = por %p219_p10, %p218_p9 }
  0x1a   :  { %v38_v11 = vrot.slane %v23_v6, %v37_v5  ;;  %v55_v13 = vrot.slane %v24_v7, %v37_v5  ;;  %v72_v15 = vrot.slane %v25_v8, %v37_v5  ;;  %v89_v17 = vrot.slane %v26_v9, %v37_v5 }
  0x1b   :  { %v45_v18 = vrot.slane %v31_v10, %v37_v5  ;;  %v62_v20 = vrot.slane %v48_v12, %v37_v5  ;;  %v79_v22 = vrot.slane %v65_v14, %v37_v5  ;;  %v96_v24 = vrot.slane %v82_v16, %v37_v5  ;;  %p221_p12 = pnand %p220_p11, %p214_p8 }
  0x1c   :  { %v46_v19 = vcombine.high %v38_v11, %v38_v11  ;;  %v63_v21 = vcombine.high %v55_v13, %v55_v13  ;;  %v80_v23 = vcombine.high %v72_v15, %v72_v15  ;;  %v97_v26 = vcombine.high %v89_v17, %v89_v17 }
  0x1d   :  { %v47_v25 = vcombine.high %v45_v18, %v45_v18  ;;  %v116_v27 = vsel %vm115_vm0, %v38_v11, 0.0  ;;  %v117_v28 = vsel %vm115_vm0, %v55_v13, 0.0  ;;  %v64_v29 = vcombine.high %v62_v20, %v62_v20 }
  0x1e   :  { %v81_v30 = vcombine.high %v79_v22, %v79_v22  ;;  %v118_v31 = vadd.f32 %v117_v28, %v116_v27  ;;  %v119_v32 = vsel %vm115_vm0, %v72_v15, 0.0  ;;  %v121_v33 = vsel %vm115_vm0, %v89_v17, 0.0 }
  0x1f   :  { %v123_v34 = vsel %vm115_vm0, %v46_v19, 0.0  ;;  %v124_v35 = vsel %vm115_vm0, %v63_v21, 0.0  ;;  %v126_v36 = vsel %vm115_vm0, %v80_v23, 0.0  ;;  %v98_v37 = vcombine.high %v96_v24, %v96_v24 }
  0x20   :  { %v120_v38 = vadd.f32 %v119_v32, %v118_v31  ;;  %v125_v39 = vadd.f32 %v124_v35, %v123_v34  ;;  %v130_v40 = vsel %vm115_vm0, %v45_v18, 0.0  ;;  %v128_v41 = vsel %vm115_vm0, %v97_v26, 0.0 }
  0x21   :  { %v131_v42 = vsel %vm115_vm0, %v62_v20, 0.0  ;;  %v133_v43 = vsel %vm115_vm0, %v79_v22, 0.0  ;;  %v137_v44 = vsel %vm115_vm0, %v47_v25, 0.0  ;;  %v138_v48 = vsel %vm115_vm0, %v64_v29, 0.0 }
  0x22   :  { %v122_v45 = vadd.f32 %v121_v33, %v120_v38  ;;  %v127_v46 = vadd.f32 %v126_v36, %v125_v39  ;;  %v132_v47 = vadd.f32 %v131_v42, %v130_v40  ;;  %v135_v49 = vsel %vm115_vm0, %v96_v24, 0.0 }
  0x23   :  { %v139_v50 = vadd.f32 %v138_v48, %v137_v44  ;;  %v140_v51 = vsel %vm115_vm0, %v81_v30, 0.0  ;;  %v142_v54 = vsel %vm115_vm0, %v98_v37, 0.0 }
  0x24   :  { %v129_v52 = vadd.f32 %v128_v41, %v127_v46  ;;  %v134_v53 = vadd.f32 %v133_v43, %v132_v47 }
  0x25   :  { %v141_v55 = vadd.f32 %v140_v51, %v139_v50 }
  0x26   :  { %v136_v56 = vadd.f32 %v135_v49, %v134_v53  ;;  %v148_v57 = vcombine.low %v122_v45, %v129_v52 }
  0x27   :  { %v143_v58 = vadd.f32 %v142_v54, %v141_v55 }
  0x28   :  { %v156_v60 = vrot.slane %v148_v57, %v37_v5 }
  0x29   :  { %v149_v59 = vcombine.low %v136_v56, %v143_v58 }
  0x2b   :  { %v163_v61 = vrot.slane %v149_v59, %v37_v5 }
  0x2d   :  { %v164_v62 = vcombine.low %v156_v60, %v163_v61 }
  0x2f   :  { %166 = vst [vmem:[#allocation5] sm:$0xff] %v164_v62 }
  0x30   :  { %224 = shalt.err (!%p221_p12)
}
  0x31   :  { %s225_s24 = scalar_lea.hbm %s295_s1, 128 }
  0x32   :  { %p226_p13 = scmp.ne.s32.totalorder %s295_s1, %s225_s24  ;;  %p229_p0 = scmp.lt.u32.totalorder %s225_s24, %s295_s1 }
  0x34   :  { %p231_p1 = pnand %p229_p0, %p226_p13 }
  0x36   :  { %234 = shalt.err (!%p231_p1)
}
  0x37   :  { %176 = dma.vmem_to_hbm [thread:$0]  %s174_s20, 128, %s295_s1, [#allocation4]  }
  0x38   :  { %237 = dma.done.wait [#allocation4], 128  }
  0x39   :  { %238 = vsyncadd [#allocation4], 4294967168 }
  0x3a   :  { %180 = vsyncpa [#allocation3], 1 }
  0x3b   :  { %181 = vsyncpa [#allocation4], 1 }

</bundles_post_ra>
